<compile_context>
chip_gen: v7x
topology: tpu7x:2x2x1
jax: 0.10.0
libtpu: 0.0.40
codegen_flags: <defaults>
</compile_context>

<pallas_src>
import functools

import jax
import jax.numpy as jnp
from jax.experimental import pallas as pl
from jax.experimental.pallas import tpu as pltpu


def _round_up(x, m):
    return ((x + m - 1) // m) * m


def _vmem_capacity_bytes():
    """Generation-aware VMEM capacity (v5e/v6e: 128 MiB, v7x: 64 MiB per TC)."""
    try:
        info = pltpu.get_tpu_info()
        for attr in ("vmem_capacity_bytes", "vmem_size_bytes", "vmem_bytes"):
            cap = getattr(info, attr, None)
            if cap:
                return int(cap)
    except Exception:
        pass
    return 64 * 1024 * 1024  # conservative fallback (v7x per-core size)


def _mlp_kernel_resident(x_ref, w1_ref, b1_ref, w2_ref, b2_ref, w3_ref, b3_ref, o_ref):
    # Fused 3-layer MLP: bf16 MXU matmuls with f32 accumulation, f32 bias/relu on
    # the VPU, lane-dense (128-wide) f32 output store. All weights VMEM-resident.
    x = x_ref[...]                                                         # bf16 [bt, K]
    h1 = jnp.dot(x, w1_ref[...], preferred_element_type=jnp.float32) + b1_ref[...]
    h1 = jnp.maximum(h1, 0.0).astype(jnp.bfloat16)
    h2 = jnp.dot(h1, w2_ref[...], preferred_element_type=jnp.float32) + b2_ref[...]
    h2 = jnp.maximum(h2, 0.0).astype(jnp.bfloat16)
    y = jnp.dot(h2, w3_ref[...], preferred_element_type=jnp.float32) + b3_ref[...]
    o_ref[...] = y.astype(o_ref.dtype)


def _mlp_kernel_streamed(x_ref, w1_ref, b1_ref, w2_ref, b2_ref, w3_ref, b3_ref,
                         o_ref, h1_ref, acc_ref):
    # Large-expansion path: grid = (batch_tiles, hidden_tiles). W2 column-tiles and
    # W3 row-tiles stream through VMEM (double-buffered by the Pallas pipeline);
    # h1 lives in a bf16 scratch computed once per batch tile, y accumulates in f32.
    j = pl.program_id(1)

    @pl.when(j == 0)
    def _():
        h1 = jnp.dot(x_ref[...], w1_ref[...],
                     preferred_element_type=jnp.float32) + b1_ref[...]
        h1_ref[...] = jnp.maximum(h1, 0.0).astype(jnp.bfloat16)
        acc_ref[...] = jnp.zeros_like(acc_ref)

    h2 = jnp.dot(h1_ref[...], w2_ref[...],
                 preferred_element_type=jnp.float32) + b2_ref[...]
    h2 = jnp.maximum(h2, 0.0).astype(jnp.bfloat16)
    acc_ref[...] += jnp.dot(h2, w3_ref[...], preferred_element_type=jnp.float32)

    @pl.when(j == pl.num_programs(1) - 1)
    def _():
        o_ref[...] = (acc_ref[...] + b3_ref[...]).astype(o_ref.dtype)


@functools.partial(jax.jit, static_argnames=("batch_tile", "hidden_block"))
def expandable_fc_relu_mnist(x, w1, b1, w2, b2, w3, b3, *,
                             batch_tile=256, hidden_block=None):
    """Forward pass of ExpandableFcReLu_mnist.

    x:  [B, 1, 28, 28] float32 (NCHW, like the PyTorch module)
    w*: [in_features, out_features]  (transposed vs. PyTorch's [out, in])
    b*: [out_features]
    hidden_block: force the streamed-5E path with this tile (multiple of 128);
                  None = auto (resident weights when they fit the VMEM budget).
    returns: [B, out_classes] float32
    """
    B = x.shape[0]
    in_feat, E = w1.shape
    H2 = w2.shape[1]
    out_classes = w3.shape[1]

    # ---- static layout decisions -------------------------------------------
    # Lane-pad every matmul dimension to a 128 multiple. Zero padding is exact
    # through bias+ReLU (padded lanes stay 0 and hit zero weight rows).
    K = _round_up(in_feat, 128)          # 784 -> 896
    E_pad = _round_up(E, 128)
    H2_pad = _round_up(H2, 128)
    OUTP = _round_up(out_classes, 128)   # 10 -> 128 (unmasked full-lane stores)

    # Batch tile: round tiny batches to 16 (bf16 sublane packing), cap at
    # batch_tile (default 256 keeps padding waste < 256 rows and the M dim
    # MXU-friendly on all generations).
    bt = max(16, min(int(batch_tile), _round_up(B, 16)))
    bt = max(16, (bt // 16) * 16)
    B_pad = _round_up(B, bt)
    # v7x megacore: if one giant tile would cover the whole (>=512-row) batch,
    # split it so the "parallel" batch axis has >=2 steps (both TensorCores busy).
    if B_pad // bt < 2 and B_pad >= 512 and bt % 32 == 0:
        bt = bt // 2

    # ---- VMEM budgeting / path selection ------------------------------------
    vmem_cap = _vmem_capacity_bytes()
    budget = int(vmem_cap * 0.85)

    def resident_vmem():
        return (2 * bt * K * 2 + 2 * bt * OUTP * 4                     # x / out tiles (2-buf)
                + (K * E_pad + E_pad * H2_pad + H2_pad * OUTP) * 2     # weights (Buffered(1))
                + (E_pad + H2_pad + OUTP) * 4                          # biases
                + bt * E_pad * (4 + 2) + bt * H2_pad * (4 + 2)         # f32 pre-ReLU + bf16 h1/h2
                + bt * OUTP * 4)                                       # f32 y

    def streamed_vmem(th):
        return (2 * bt * K * 2 + 2 * bt * OUTP * 4
                + K * E_pad * 2 + E_pad * 4                            # resident W1 / b1
                + 2 * (E_pad * th * 2 + th * 4 + th * OUTP * 2)        # streamed W2 / b2 / W3
                + OUTP * 4
                + bt * E_pad * 2 + bt * OUTP * 4                       # scratch: h1 bf16, acc f32
                + bt * E_pad * 4 + bt * th * (4 + 2) + bt * OUTP * 4)  # temporaries

    use_stream = (hidden_block is not None) or (resident_vmem() > budget)
    tile_h = None
    if use_stream:
        if hidden_block is not None:
            tile_h = max(128, _round_up(int(hidden_block), 128))
            H2_pad = _round_up(H2_pad, tile_h)
        else:
            # Largest 128-multiple divisor of H2_pad that fits the budget.
            m = H2_pad // 128
            cands = sorted((128 * d for d in range(1, m + 1) if m % d == 0),
                           reverse=True)
            tile_h = 128
            for c in cands:
                if streamed_vmem(c) <= budget:
                    tile_h = c
                    break

    # ---- wrapper-side layout prep (plain JAX glue) ---------------------------
    x2d = x.reshape(B, -1).astype(jnp.float32)
    x2d = jnp.pad(x2d, ((0, B_pad - B), (0, K - in_feat)))
    xb = x2d.astype(jnp.bfloat16)

    w1p = jnp.pad(w1.astype(jnp.float32),
                  ((0, K - in_feat), (0, E_pad - E))).astype(jnp.bfloat16)
    b1r = jnp.pad(b1.astype(jnp.float32), (0, E_pad - E)).reshape(1, -1)
    w2p = jnp.pad(w2.astype(jnp.float32),
                  ((0, E_pad - E), (0, H2_pad - H2))).astype(jnp.bfloat16)
    b2r = jnp.pad(b2.astype(jnp.float32), (0, H2_pad - H2)).reshape(1, -1)
    w3p = jnp.pad(w3.astype(jnp.float32),
                  ((0, H2_pad - H2), (0, OUTP - out_classes))).astype(jnp.bfloat16)
    b3r = jnp.pad(b3.astype(jnp.float32), (0, OUTP - out_classes)).reshape(1, -1)

    # ---- advisory cost estimate ---------------------------------------------
    flops = 2 * B_pad * (K * E_pad + E_pad * H2_pad + H2_pad * OUTP)
    if use_stream:
        weight_reads = (K * E_pad * 2
                        + (B_pad // bt) * (E_pad * H2_pad + H2_pad * OUTP) * 2)
    else:
        weight_reads = (K * E_pad + E_pad * H2_pad + H2_pad * OUTP) * 2
    bytes_accessed = (xb.size * 2 + weight_reads
                      + (b1r.size + b2r.size + b3r.size) * 4 + B_pad * OUTP * 4)
    cost = pl.CostEstimate(flops=flops, transcendentals=0,
                           bytes_accessed=bytes_accessed)
    vmem_limit = int(budget)

    out_shape = jax.ShapeDtypeStruct((B_pad, OUTP), jnp.float32)

    if not use_stream:
        # Weights/biases: one full block each, single-buffered (constant index_map
        # -> no re-DMA per batch tile, and no pointless second VMEM copy).
        res = lambda a: pl.BlockSpec(a.shape, lambda i: (0, 0),
                                     pipeline_mode=pl.Buffered(buffer_count=1))
        out = pl.pallas_call(
            _mlp_kernel_resident,
            out_shape=out_shape,
            grid_spec=pltpu.PrefetchScalarGridSpec(
                num_scalar_prefetch=0,
                grid=(B_pad // bt,),
                in_specs=[
                    pl.BlockSpec((bt, K), lambda i: (i, 0)),   # x batch tile
                    res(w1p), res(b1r),
                    res(w2p), res(b2r),
                    res(w3p), res(b3r),
                ],
                out_specs=pl.BlockSpec((bt, OUTP), lambda i: (i, 0)),
            ),
            compiler_params=pltpu.CompilerParams(
                dimension_semantics=("parallel",),
                vmem_limit_bytes=vmem_limit),
            cost_estimate=cost,
        )(xb, w1p, b1r, w2p, b2r, w3p, b3r)
    else:
        res2 = lambda a: pl.BlockSpec(a.shape, lambda i, j: (0, 0),
                                      pipeline_mode=pl.Buffered(buffer_count=1))
        out = pl.pallas_call(
            _mlp_kernel_streamed,
            out_shape=out_shape,
            grid_spec=pltpu.PrefetchScalarGridSpec(
                num_scalar_prefetch=0,
                grid=(B_pad // bt, H2_pad // tile_h),
                in_specs=[
                    pl.BlockSpec((bt, K), lambda i, j: (i, 0)),          # x batch tile
                    res2(w1p), res2(b1r),                                # resident layer 1
                    pl.BlockSpec((E_pad, tile_h), lambda i, j: (0, j)),  # W2 column tile
                    pl.BlockSpec((1, tile_h), lambda i, j: (0, j)),      # b2 tile
                    pl.BlockSpec((tile_h, OUTP), lambda i, j: (j, 0)),   # W3 row tile
                    res2(b3r),
                ],
                out_specs=pl.BlockSpec((bt, OUTP), lambda i, j: (i, 0)),
                scratch_shapes=[pltpu.VMEM((bt, E_pad), jnp.bfloat16),   # h1 (per batch tile)
                                pltpu.VMEM((bt, OUTP), jnp.float32)],    # y accumulator
            ),
            compiler_params=pltpu.CompilerParams(
                dimension_semantics=("parallel", "arbitrary"),
                vmem_limit_bytes=vmem_limit),
            cost_estimate=cost,
        )(xb, w1p, b1r, w2p, b2r, w3p, b3r)

    return out[:B, :out_classes]


def init_params(key, expansion, out_classes=10, in_features=784):
    """Deterministic init mimicking nn.Linear's U(-1/sqrt(fan_in), 1/sqrt(fan_in)).

    Returns weights in [in, out] layout (transposed vs. PyTorch's [out, in])."""
    dims = [(in_features, expansion),
            (expansion, 5 * expansion),
            (5 * expansion, out_classes)]
    params = []
    for i, (fan_in, fan_out) in enumerate(dims):
        kw, kb = jax.random.split(jax.random.fold_in(key, i))
        bound = 1.0 / jnp.sqrt(fan_in)
        w = jax.random.uniform(kw, (fan_in, fan_out), jnp.float32, -bound, bound)
        b = jax.random.uniform(kb, (fan_out,), jnp.float32, -bound, bound)
        params += [w, b]
    return params


def _reference_bf16(x, w1, b1, w2, b2, w3, b3):
    # Matches the kernel's numerics: bf16 matmul inputs, f32 accumulation.
    x2d = x.reshape(x.shape[0], -1)
    f = jnp.bfloat16
    h1 = jnp.maximum(
        jnp.dot(x2d.astype(f), w1.astype(f), preferred_element_type=jnp.float32) + b1, 0.0)
    h2 = jnp.maximum(
        jnp.dot(h1.astype(f), w2.astype(f), preferred_element_type=jnp.float32) + b2, 0.0)
    return jnp.dot(h2.astype(f), w3.astype(f), preferred_element_type=jnp.float32) + b3


if __name__ == "__main__":
    key = jax.random.PRNGKey(0)
    kx, kp = jax.random.split(key)

    batch = 2
    expansion = 32          # small but consistent with the module's structure
    out_classes = 10

    x = jax.random.normal(kx, (batch, 1, 28, 28), jnp.float32)  # NCHW, 1*28*28 = 784
    w1, b1, w2, b2, w3, b3 = init_params(kp, expansion, out_classes)

    y_ref = _reference_bf16(x, w1, b1, w2, b2, w3, b3)

    # Path 1: fully-resident weights (common case for small/medium expansion).
    y = jax.block_until_ready(expandable_fc_relu_mnist(x, w1, b1, w2, b2, w3, b3))
    assert y.shape == (batch, out_classes)
    assert jnp.allclose(y, y_ref, atol=1e-2, rtol=1e-2), float(jnp.max(jnp.abs(y - y_ref)))

    # Path 2: force the streamed-hidden (large-expansion / v7x) path at small size
    # so it stays compile/run tested.
    y_s = jax.block_until_ready(
        expandable_fc_relu_mnist(x, w1, b1, w2, b2, w3, b3, hidden_block=128))
    assert y_s.shape == (batch, out_classes)
    assert jnp.allclose(y_s, y_ref, atol=1e-2, rtol=1e-2), float(jnp.max(jnp.abs(y_s - y_ref)))

    print("KERNEL_OK")
</pallas_src>

<mosaic_0001>
module attributes {stable_mosaic.version = 11 : i64} {
  func.func @_mlp_kernel_resident(%arg0: i32, %arg1: memref<16x896xbf16, #tpu.memory_space<vmem>>, %arg2: memref<896x128xbf16, #tpu.memory_space<vmem>>, %arg3: memref<1x128xf32, #tpu.memory_space<vmem>>, %arg4: memref<128x256xbf16, #tpu.memory_space<vmem>>, %arg5: memref<1x256xf32, #tpu.memory_space<vmem>>, %arg6: memref<256x128xbf16, #tpu.memory_space<vmem>>, %arg7: memref<1x128xf32, #tpu.memory_space<vmem>>, %arg8: memref<16x128xf32, #tpu.memory_space<vmem>>) attributes {dimension_semantics = [#tpu.dimension_semantics<parallel>], iteration_bounds = array<i64: 1>, scalar_prefetch = 0 : i64, scratch_operands = 0 : i64, tpu.core_type = #tpu.core_type<tc>, window_params = [{transform_indices = @transform_0, window_bounds = array<i64: 16, 896>}, {pipeline_mode = #tpu.pipeline_mode<synchronous>, transform_indices = @transform_1, window_bounds = array<i64: 896, 128>}, {pipeline_mode = #tpu.pipeline_mode<synchronous>, transform_indices = @transform_2, window_bounds = array<i64: 1, 128>}, {pipeline_mode = #tpu.pipeline_mode<synchronous>, transform_indices = @transform_3, window_bounds = array<i64: 128, 256>}, {pipeline_mode = #tpu.pipeline_mode<synchronous>, transform_indices = @transform_4, window_bounds = array<i64: 1, 256>}, {pipeline_mode = #tpu.pipeline_mode<synchronous>, transform_indices = @transform_5, window_bounds = array<i64: 256, 128>}, {pipeline_mode = #tpu.pipeline_mode<synchronous>, transform_indices = @transform_6, window_bounds = array<i64: 1, 128>}, {transform_indices = @transform_7, window_bounds = array<i64: 16, 128>}]} {
    %c0 = arith.constant 0 : index
    %c0_0 = arith.constant 0 : index
    %0 = vector.load %arg1[%c0, %c0_0] : memref<16x896xbf16, #tpu.memory_space<vmem>>, vector<16x896xbf16>
    %c0_1 = arith.constant 0 : index
    %c0_2 = arith.constant 0 : index
    %1 = vector.load %arg2[%c0_1, %c0_2] : memref<896x128xbf16, #tpu.memory_space<vmem>>, vector<896x128xbf16>
    %cst = arith.constant dense<0.000000e+00> : vector<16x128xf32>
    %2 = tpu.matmul %0, %1, %cst {dimension_numbers = #tpu.dot_dimension_numbers<[1], [0], [0], [1], [0, 0, 1, 1], [], []>} : vector<16x896xbf16>, vector<896x128xbf16>, vector<16x128xf32> -> vector<16x128xf32>
    %c0_3 = arith.constant 0 : index
    %c0_4 = arith.constant 0 : index
    %3 = vector.load %arg3[%c0_3, %c0_4] : memref<1x128xf32, #tpu.memory_space<vmem>>, vector<1x128xf32>
    %4 = vector.broadcast %3 : vector<1x128xf32> to vector<16x128xf32>
    %5 = arith.addf %2, %4 : vector<16x128xf32>
    %cst_5 = arith.constant 0.000000e+00 : f32
    %6 = vector.broadcast %cst_5 : f32 to vector<16x128xf32>
    %7 = arith.maximumf %5, %6 : vector<16x128xf32>
    %8 = arith.truncf %7 : vector<16x128xf32> to vector<16x128xbf16>
    %c0_6 = arith.constant 0 : index
    %c0_7 = arith.constant 0 : index
    %9 = vector.load %arg4[%c0_6, %c0_7] : memref<128x256xbf16, #tpu.memory_space<vmem>>, vector<128x256xbf16>
    %cst_8 = arith.constant dense<0.000000e+00> : vector<16x256xf32>
    %10 = tpu.matmul %8, %9, %cst_8 {dimension_numbers = #tpu.dot_dimension_numbers<[1], [0], [0], [1], [0, 0, 1, 1], [], []>} : vector<16x128xbf16>, vector<128x256xbf16>, vector<16x256xf32> -> vector<16x256xf32>
    %c0_9 = arith.constant 0 : index
    %c0_10 = arith.constant 0 : index
    %11 = vector.load %arg5[%c0_9, %c0_10] : memref<1x256xf32, #tpu.memory_space<vmem>>, vector<1x256xf32>
    %12 = vector.broadcast %11 : vector<1x256xf32> to vector<16x256xf32>
    %13 = arith.addf %10, %12 : vector<16x256xf32>
    %cst_11 = arith.constant 0.000000e+00 : f32
    %14 = vector.broadcast %cst_11 : f32 to vector<16x256xf32>
    %15 = arith.maximumf %13, %14 : vector<16x256xf32>
    %16 = arith.truncf %15 : vector<16x256xf32> to vector<16x256xbf16>
    %c0_12 = arith.constant 0 : index
    %c0_13 = arith.constant 0 : index
    %17 = vector.load %arg6[%c0_12, %c0_13] : memref<256x128xbf16, #tpu.memory_space<vmem>>, vector<256x128xbf16>
    %cst_14 = arith.constant dense<0.000000e+00> : vector<16x128xf32>
    %18 = tpu.matmul %16, %17, %cst_14 {dimension_numbers = #tpu.dot_dimension_numbers<[1], [0], [0], [1], [0, 0, 1, 1], [], []>} : vector<16x256xbf16>, vector<256x128xbf16>, vector<16x128xf32> -> vector<16x128xf32>
    %c0_15 = arith.constant 0 : index
    %c0_16 = arith.constant 0 : index
    %19 = vector.load %arg7[%c0_15, %c0_16] : memref<1x128xf32, #tpu.memory_space<vmem>>, vector<1x128xf32>
    %20 = vector.broadcast %19 : vector<1x128xf32> to vector<16x128xf32>
    %21 = arith.addf %18, %20 : vector<16x128xf32>
    %c0_17 = arith.constant 0 : index
    %c0_18 = arith.constant 0 : index
    %22 = vector.load %arg8[%c0_17, %c0_18] : memref<16x128xf32, #tpu.memory_space<vmem>>, vector<16x128xf32>
    tpu.vector_store %arg8[%c0_17, %c0_18], %21 {strides = array<i32>} : memref<16x128xf32, #tpu.memory_space<vmem>>, vector<16x128xf32>,
    return
  }
  func.func @transform_0(%arg0: i32) -> (i32, i32) {
    %c0_i32 = arith.constant 0 : i32
    %c0_i32_0 = arith.constant 0 : i32
    return %arg0, %c0_i32 : i32, i32
  }
  func.func @transform_1(%arg0: i32) -> (i32, i32) {
    %c0_i32 = arith.constant 0 : i32
    %c0_i32_0 = arith.constant 0 : i32
    %c0_i32_1 = arith.constant 0 : i32
    return %c0_i32, %c0_i32_0 : i32, i32
  }
  func.func @transform_2(%arg0: i32) -> (i32, i32) {
    %c0_i32 = arith.constant 0 : i32
    %c0_i32_0 = arith.constant 0 : i32
    %c0_i32_1 = arith.constant 0 : i32
    return %c0_i32, %c0_i32_0 : i32, i32
  }
  func.func @transform_3(%arg0: i32) -> (i32, i32) {
    %c0_i32 = arith.constant 0 : i32
    %c0_i32_0 = arith.constant 0 : i32
    %c0_i32_1 = arith.constant 0 : i32
    return %c0_i32, %c0_i32_0 : i32, i32
  }
  func.func @transform_4(%arg0: i32) -> (i32, i32) {
    %c0_i32 = arith.constant 0 : i32
    %c0_i32_0 = arith.constant 0 : i32
    %c0_i32_1 = arith.constant 0 : i32
    return %c0_i32, %c0_i32_0 : i32, i32
  }
  func.func @transform_5(%arg0: i32) -> (i32, i32) {
    %c0_i32 = arith.constant 0 : i32
    %c0_i32_0 = arith.constant 0 : i32
    %c0_i32_1 = arith.constant 0 : i32
    return %c0_i32, %c0_i32_0 : i32, i32
  }
  func.func @transform_6(%arg0: i32) -> (i32, i32) {
    %c0_i32 = arith.constant 0 : i32
    %c0_i32_0 = arith.constant 0 : i32
    %c0_i32_1 = arith.constant 0 : i32
    return %c0_i32, %c0_i32_0 : i32, i32
  }
  func.func @transform_7(%arg0: i32) -> (i32, i32) {
    %c0_i32 = arith.constant 0 : i32
    %c0_i32_0 = arith.constant 0 : i32
    return %arg0, %c0_i32 : i32, i32
  }
}

</mosaic_0001>

<bundles_post_ra>
// kernel: expandable_fc_relu_mnist.1
= control target key start
LH: loop header
LB: loop body
LE: loop exit
PB: predicated region body
PF: predicated region fallthrough
CT: control target
= control target key end

     0   :  { %v1355_v38 = vmov 0.0   ;;  %vm1356_vm0 = vmmov 0   ;;  %s1698_s1 = inlined_call_operand.vmem [shape: bf16[896,128], index: 1, kind: input, shape index: {}]   ;;  %s1699_s0 = inlined_call_operand.vmem [shape: bf16[16,896], index: 0, kind: input, shape index: {}]   ;;  %s1700_s3 = inlined_call_operand.vmem [shape: bf16[128,256], index: 3, kind: input, shape index: {}]   ;;  %s1701_s5 = inlined_call_operand.vmem [shape: bf16[256,128], index: 5, kind: input, shape index: {}]   ;;  %s1702_s2 = inlined_call_operand.vmem [shape: f32[1,128], index: 2, kind: input, shape index: {}]   ;;  %s1703_s4 = inlined_call_operand.vmem [shape: f32[1,256], index: 4, kind: input, shape index: {}]   ;;  %s1704_s6 = inlined_call_operand.vmem [shape: f32[1,128], index: 6, kind: input, shape index: {}]   ;;  %s1705_s7 = inlined_call_operand.vmem [shape: f32[16,128], index: 7, kind: output, shape index: {}]  }
   0x1   :  { %v1249_v0 = vld [vmem:[%s1698_s1 + $0x40] sm:$0xff]   ;;  %v1253_v4 = vld [vmem:[%s1698_s1 + $0x48] sm:$0xff]   ;;  %v1257_v8 = vld [vmem:[%s1698_s1 + $0x50] sm:$0xff]  }
   0x2   :  { %v1250_v1 = vld [vmem:[%s1698_s1] sm:$0xff]   ;;  %1129 = vmatprep.subr.bf16.mxu0 %v1249_v0  ;;  %v1254_v5 = vld [vmem:[%s1698_s1 + $0x8] sm:$0xff]   ;;  %v1258_v9 = vld [vmem:[%s1698_s1 + $0x10] sm:$0xff]  }
   0x3   :  { %v1251_v2 = vld [vmem:[%s1698_s1 + $0xc0] sm:$0xff]   ;;  %1130 = vmatpush3.bf16.msra.mxu0 %v1250_v1  ;;  %v1255_v6 = vld [vmem:[%s1698_s1 + $0xc8] sm:$0xff]   ;;  %v1259_v10 = vld [vmem:[%s1698_s1 + $0xd0] sm:$0xff]  }
   0x4   :  { %v1252_v3 = vld [vmem:[%s1698_s1 + $0x80] sm:$0xff]   ;;  %1151 = vmatprep.subr.bf16.mxu1 %v1251_v2  ;;  %1131 = vmatprep.subr.bf16.mxu0 %v1253_v4  ;;  %v1256_v7 = vld [vmem:[%s1698_s1 + $0x88] sm:$0xff]   ;;  %v1260_v11 = vld [vmem:[%s1698_s1 + $0x90] sm:$0xff]  }
   0x5   :  { %1152 = vmatpush3.bf16.msra.mxu1 %v1252_v3  ;;  %v1261_v12 = vld [vmem:[%s1698_s1 + $0x58] sm:$0xff]   ;;  %v1265_v16 = vld [vmem:[%s1698_s1 + $0x60] sm:$0xff]   ;;  %v1269_v20 = vld [vmem:[%s1698_s1 + $0x68] sm:$0xff]  }
   0x6   :  { %1153 = vmatprep.subr.bf16.mxu1 %v1255_v6  ;;  %v1262_v13 = vld [vmem:[%s1698_s1 + $0x18] sm:$0xff]   ;;  %v1266_v17 = vld [vmem:[%s1698_s1 + $0x20] sm:$0xff]   ;;  %v1270_v21 = vld [vmem:[%s1698_s1 + $0x28] sm:$0xff]  }
   0x7   :  { %1132 = vmatpush3.bf16.msra.mxu0 %v1254_v5  ;;  %v1263_v14 = vld [vmem:[%s1698_s1 + $0xd8] sm:$0xff]   ;;  %v1267_v18 = vld [vmem:[%s1698_s1 + $0xe0] sm:$0xff]   ;;  %v1271_v22 = vld [vmem:[%s1698_s1 + $0xe8] sm:$0xff]  }
   0x8   :  { %1133 = vmatprep.subr.bf16.mxu0 %v1257_v8  ;;  %v1264_v15 = vld [vmem:[%s1698_s1 + $0x98] sm:$0xff]   ;;  %v1268_v19 = vld [vmem:[%s1698_s1 + $0xa0] sm:$0xff]   ;;  %v1272_v23 = vld [vmem:[%s1698_s1 + $0xa8] sm:$0xff]  }
   0x9   :  { %1154 = vmatpush3.bf16.msra.mxu1 %v1256_v7  ;;  %v1273_v24 = vld [vmem:[%s1698_s1 + $0x70] sm:$0xff]   ;;  %v1277_v28 = vld [vmem:[%s1698_s1 + $0x78] sm:$0xff]   ;;  %v1282_v32 = vld [vmem:[%s1699_s0 + $0x4] ss:$28 sps:$4 sm:$0xff]  }
   0xa   :  { %1155 = vmatprep.subr.bf16.mxu1 %v1259_v10  ;;  %v1274_v25 = vld [vmem:[%s1698_s1 + $0x30] sm:$0xff]   ;;  %v1278_v29 = vld [vmem:[%s1698_s1 + $0x38] sm:$0xff]   ;;  %558 = vmatprep.mubr.bf16.mxu0 %v1282_v32  ;;  %v1284_v34 = vld [vmem:[%s1698_s1 + $0x140] sm:$0xff]  }
   0xb   :  { %1134 = vmatpush3.bf16.msra.mxu0 %v1258_v9  ;;  %v1275_v26 = vld [vmem:[%s1698_s1 + $0xf0] sm:$0xff]   ;;  %v1279_v30 = vld [vmem:[%s1698_s1 + $0xf8] sm:$0xff]   ;;  %v1285_v35 = vld [vmem:[%s1699_s0 + $0x8] ss:$28 sps:$4 sm:$0xff]  }
   0xc   :  { %1135 = vmatprep.subr.bf16.mxu0 %v1261_v12  ;;  %v1276_v27 = vld [vmem:[%s1698_s1 + $0xb0] sm:$0xff]   ;;  %v1280_v31 = vld [vmem:[%s1699_s0] ss:$28 sps:$4 sm:$0xff]   ;;  %v1287_v36 = vld [vmem:[%s1699_s0 + $0xc] ss:$28 sps:$4 sm:$0xff]  }
   0xd   :  { %1156 = vmatpush3.bf16.msra.mxu1 %v1260_v11  ;;  %v1283_v33 = vld [vmem:[%s1698_s1 + $0xb8] sm:$0xff]   ;;  %v1288_v37 = vld [vmem:[%s1698_s1 + $0x100] sm:$0xff]   ;;  %599 = vmatprep.mubr.bf16.mxu1 %v1287_v36  ;;  %v1290_v40 = vld [vmem:[%s1698_s1 + $0x148] sm:$0xff]  }
   0xe   :  { %1157 = vmatprep.subr.bf16.mxu1 %v1263_v14  ;;  %v1289_v39 = vld [vmem:[%s1698_s1 + $0x180] sm:$0xff]   ;;  %v1291_v41 = vld [vmem:[%s1698_s1 + $0x108] sm:$0xff]   ;;  %v1293_v43 = vld [vmem:[%s1698_s1 + $0x150] sm:$0xff]  }
   0xf   :  { %1136 = vmatpush3.bf16.msra.mxu0 %v1262_v13  ;;  %v1292_v42 = vld [vmem:[%s1698_s1 + $0x188] sm:$0xff]   ;;  %v1294_v44 = vld [vmem:[%s1698_s1 + $0x110] sm:$0xff]   ;;  %v1296_v46 = vld [vmem:[%s1698_s1 + $0x158] sm:$0xff]  }
  0x10   :  { %1137 = vmatprep.subr.bf16.mxu0 %v1265_v16  ;;  %v1295_v45 = vld [vmem:[%s1698_s1 + $0x190] sm:$0xff]   ;;  %v1297_v47 = vld [vmem:[%s1698_s1 + $0x118] sm:$0xff]   ;;  %v1299_v49 = vld [vmem:[%s1698_s1 + $0x160] sm:$0xff]   ;;  %v1357_v16 = vmov 0  }
  0x11   :  { %1158 = vmatpush3.bf16.msra.mxu1 %v1264_v15  ;;  %v1298_v48 = vld [vmem:[%s1698_s1 + $0x198] sm:$0xff]   ;;  %v1300_v50 = vld [vmem:[%s1698_s1 + $0x120] sm:$0xff]   ;;  %v1302_v52 = vld [vmem:[%s1698_s1 + $0x168] sm:$0xff]  }
  0x12   :  { %1159 = vmatprep.subr.bf16.mxu1 %v1267_v18  ;;  %v1301_v51 = vld [vmem:[%s1698_s1 + $0x1a0] sm:$0xff]   ;;  %v1303_v53 = vld [vmem:[%s1698_s1 + $0x128] sm:$0xff]   ;;  %v1305_v55 = vld [vmem:[%s1698_s1 + $0x170] sm:$0xff]  }
  0x13   :  { %1138 = vmatpush3.bf16.msra.mxu0 %v1266_v17  ;;  %v1304_v54 = vld [vmem:[%s1698_s1 + $0x1a8] sm:$0xff]   ;;  %v1306_v56 = vld [vmem:[%s1698_s1 + $0x130] sm:$0xff]   ;;  %v1308_v59 = vld [vmem:[%s1698_s1 + $0x178] sm:$0xff]  }
  0x14   :  { %1139 = vmatprep.subr.bf16.mxu0 %v1269_v20  ;;  %v1307_v57 = vld [vmem:[%s1698_s1 + $0x1b0] sm:$0xff]   ;;  %v1309_v60 = vld [vmem:[%s1698_s1 + $0x138] sm:$0xff]   ;;  %v1315_v0 = vld [vmem:[%s1700_s3] ss:$8 sps:$4 sm:$0xff]  }
  0x15   :  { %1160 = vmatpush3.bf16.msra.mxu1 %v1268_v19  ;;  %v1312_v58 = vld [vmem:[%s1699_s0 + $0x14] ss:$28 sps:$4 sm:$0xff]   ;;  %v1313_v61 = vld [vmem:[%s1698_s1 + $0x1b8] sm:$0xff]   ;;  %v1317_v1 = vld [vmem:[%s1700_s3 + $0x4] ss:$8 sps:$4 sm:$0xff]  }
  0x16   :  { %1161 = vmatprep.subr.bf16.mxu1 %v1271_v22  ;;  %v1310_v62 = vld [vmem:[%s1699_s0 + $0x10] ss:$28 sps:$4 sm:$0xff]   ;;  %v1314_v63 = vld [vmem:[%s1699_s0 + $0x18] ss:$28 sps:$4 sm:$0xff]   ;;  %v1321_v5 = vld [vmem:[%s1700_s3 + $0x20] ss:$8 sps:$4 sm:$0xff]  }
  0x17   :  { %1140 = vmatpush3.bf16.msra.mxu0 %v1270_v21  ;;  %v1320_v2 = vld [vmem:[%s1700_s3 + $0x14] ss:$8 sps:$4 sm:$0xff]   ;;  %v1318_v3 = vld [vmem:[%s1700_s3 + $0x10] ss:$8 sps:$4 sm:$0xff]   ;;  %v1323_v4 = vld [vmem:[%s1700_s3 + $0x24] ss:$8 sps:$4 sm:$0xff]  }
  0x18   :  { %1141 = vmatprep.subr.bf16.mxu0 %v1273_v24  ;;  %v1326_v6 = vld [vmem:[%s1700_s3 + $0x34] ss:$8 sps:$4 sm:$0xff]   ;;  %v1324_v7 = vld [vmem:[%s1700_s3 + $0x30] ss:$8 sps:$4 sm:$0xff]   ;;  %v1329_v8 = vld [vmem:[%s1700_s3 + $0x44] ss:$8 sps:$4 sm:$0xff]  }
  0x19   :  { %1162 = vmatpush3.bf16.msra.mxu1 %v1272_v23  ;;  %v1327_v9 = vld [vmem:[%s1700_s3 + $0x40] ss:$8 sps:$4 sm:$0xff]   ;;  %v1332_v10 = vld [vmem:[%s1700_s3 + $0x54] ss:$8 sps:$4 sm:$0xff]   ;;  %v1330_v11 = vld [vmem:[%s1700_s3 + $0x50] ss:$8 sps:$4 sm:$0xff]  }
  0x1a   :  { %1163 = vmatprep.subr.bf16.mxu1 %v1275_v26  ;;  %v1335_v12 = vld [vmem:[%s1700_s3 + $0x64] ss:$8 sps:$4 sm:$0xff]   ;;  %v1333_v13 = vld [vmem:[%s1700_s3 + $0x60] ss:$8 sps:$4 sm:$0xff]   ;;  %v1338_v14 = vld [vmem:[%s1700_s3 + $0x74] ss:$8 sps:$4 sm:$0xff]  }
  0x1b   :  { %1142 = vmatpush3.bf16.msra.mxu0 %v1274_v25  ;;  %v1336_v15 = vld [vmem:[%s1700_s3 + $0x70] ss:$8 sps:$4 sm:$0xff]   ;;  %v1339_v17 = vld [vmem:[%s1701_s5 + $0x40] sm:$0xff]   ;;  %v1341_v19 = vld [vmem:[%s1701_s5 + $0x48] sm:$0xff]  }
  0x1c   :  { %1143 = vmatprep.subr.bf16.mxu0 %v1277_v28  ;;  %v1340_v18 = vld [vmem:[%s1701_s5] sm:$0xff]   ;;  %v1342_v20 = vld [vmem:[%s1701_s5 + $0x8] sm:$0xff]   ;;  %v1343_v21 = vld [vmem:[%s1701_s5 + $0x50] sm:$0xff]  }
  0x1d   :  { %1164 = vmatpush3.bf16.msra.mxu1 %v1276_v27  ;;  %v1344_v22 = vld [vmem:[%s1701_s5 + $0x10] sm:$0xff]   ;;  %v1345_v23 = vld [vmem:[%s1701_s5 + $0x58] sm:$0xff]   ;;  %v1347_v25 = vld [vmem:[%s1701_s5 + $0x60] sm:$0xff]  }
  0x1e   :  { %1165 = vmatprep.subr.bf16.mxu1 %v1279_v30  ;;  %v1346_v24 = vld [vmem:[%s1701_s5 + $0x18] sm:$0xff]   ;;  %v1348_v26 = vld [vmem:[%s1701_s5 + $0x20] sm:$0xff]   ;;  %v1349_v27 = vld [vmem:[%s1701_s5 + $0x68] sm:$0xff]  }
  0x1f   :  { %1144 = vmatpush3.bf16.msra.mxu0 %v1278_v29  ;;  %v1032_v29 = vld [vmem:[%s1702_s2] ss:$0 sm:$0xff] }
  0x20   :  { %1173 = vmatprep.subr.bf16.mxu0 %v1284_v34 }
  0x21   :  { %1166 = vmatpush3.bf16.msra.mxu1 %v1283_v33 }
  0x22   :  { %559 = vmatmul.mubr.bf16.vlgmr.msra.gmra.mrb[0].mxu0 %v1280_v31  ;;  %1226 = vmatprep.subr.bf16.mxu1 %v1355_v38 }
  0x23   :  { %1174 = vmatpush3.bf16.msra.mxu0 %v1288_v37  ;;  %640 = vmatprep.mubr.bf16.mxu0 %v1312_v58 }
  0x24   :  { %600 = vmatmul.mubr.bf16.vlgmr.msra.gmra.mrb[0].mxu1 %v1285_v35  ;;  %1175 = vmatprep.subr.bf16.mxu0 %v1290_v40 }
  0x25   :  { %1227 = vmatpush3.bf16.msra.mxu1 %v1289_v39  ;;  %1242 = vmatprep.mubr.msk.bf16.mxu1 %vm1356_vm0, %v1355_v38 }
  0x26   :  { %1228 = vmatprep.subr.bf16.mxu1 %v1355_v38 }
  0x27   :  { %1176 = vmatpush3.bf16.msra.mxu0 %v1291_v41 }
  0x28   :  { %1177 = vmatprep.subr.bf16.mxu0 %v1293_v43 }
  0x29   :  { %1229 = vmatpush3.bf16.msra.mxu1 %v1292_v42 }
  0x2a   :  { %1230 = vmatprep.subr.bf16.mxu1 %v1355_v38 }
  0x2b   :  { %1178 = vmatpush3.bf16.msra.mxu0 %v1294_v44 }
  0x2c   :  { %1179 = vmatprep.subr.bf16.mxu0 %v1296_v46 }
  0x2d   :  { %1231 = vmatpush3.bf16.msra.mxu1 %v1295_v45 }
  0x2e   :  { %1232 = vmatprep.subr.bf16.mxu1 %v1355_v38 }
  0x2f   :  { %1180 = vmatpush3.bf16.msra.mxu0 %v1297_v47 }
  0x30   :  { %1181 = vmatprep.subr.bf16.mxu0 %v1299_v49 }
  0x31   :  { %1233 = vmatpush3.bf16.msra.mxu1 %v1298_v48 }
  0x32   :  { %1234 = vmatprep.subr.bf16.mxu1 %v1355_v38 }
  0x33   :  { %1182 = vmatpush3.bf16.msra.mxu0 %v1300_v50 }
  0x34   :  { %1183 = vmatprep.subr.bf16.mxu0 %v1302_v52 }
  0x35   :  { %1235 = vmatpush3.bf16.msra.mxu1 %v1301_v51 }
  0x36   :  { %1236 = vmatprep.subr.bf16.mxu1 %v1355_v38 }
  0x37   :  { %1184 = vmatpush3.bf16.msra.mxu0 %v1303_v53 }
  0x38   :  { %1185 = vmatprep.subr.bf16.mxu0 %v1305_v55 }
  0x39   :  { %1237 = vmatpush3.bf16.msra.mxu1 %v1304_v54 }
  0x3a   :  { %1238 = vmatprep.subr.bf16.mxu1 %v1355_v38 }
  0x3b   :  { %1186 = vmatpush3.bf16.msra.mxu0 %v1306_v56 }
  0x3c   :  { %1187 = vmatprep.subr.bf16.mxu0 %v1308_v59 }
  0x3d   :  { %1239 = vmatpush3.bf16.msra.mxu1 %v1307_v57 }
  0x3e   :  { %1240 = vmatprep.subr.bf16.mxu1 %v1355_v38 }
  0x3f   :  { %1188 = vmatpush3.bf16.msra.mxu0 %v1309_v60 }
  0x40   :  { %801 = vmatprep.subr.bf16.mxu0 %v1317_v1  ;;  %v1353_v1 = vld [vmem:[%s1701_s5 + $0x78] sm:$0xff]  }
  0x41   :  { %1241 = vmatpush3.bf16.msra.mxu1 %v1313_v61 }
  0x42   :  { %641 = vmatmul.mubr.bf16.vlgmr.msra.gmra.mrb[4].mxu0 %v1310_v62  ;;  %1204 = vmatprep.subr.bf16.mxu1 %v1339_v17  ;;  %v1350_v62 = vld [vmem:[%s1701_s5 + $0x28] sm:$0xff]  }
  0x43   :  { %802 = vmatpush1.bf16.msra.mxu0 %v1315_v0  ;;  %833 = vmatprep.mubr.bf16.mxu0 %v1357_v16  ;;  %v1352_v0 = vld [vmem:[%s1701_s5 + $0x30] sm:$0xff]  }
  0x44   :  { %1243 = vmatmul.mubr.bf16.vlgmr.msra.gmra.mrb[4].mxu1 %v1314_v63  ;;  %803 = vmatprep.subr.bf16.mxu0 %v1320_v2  ;;  %v1351_v63 = vld [vmem:[%s1701_s5 + $0x70] sm:$0xff]   ;;  %v1354_v2 = vld [vmem:[%s1701_s5 + $0x38] sm:$0xff]  }
  0x45   :  { %1205 = vmatpush3.bf16.msra.mxu1 %v1340_v18 }
  0x46   :  { %1206 = vmatprep.subr.bf16.mxu1 %v1341_v19 }
  0x47   :  { %804 = vmatpush1.bf16.msra.mxu0 %v1318_v3  ;;  %v711_v3 = vlaneseq }
  0x48   :  { %805 = vmatprep.subr.bf16.mxu0 %v1323_v4 }
  0x49   :  { %1207 = vmatpush3.bf16.msra.mxu1 %v1342_v20  ;;  %v712_v4 = vshrl.u32 %v711_v3, 7 }
  0x4a   :  { %1208 = vmatprep.subr.bf16.mxu1 %v1343_v21 }
  0x4b   :  { %806 = vmatpush1.bf16.msra.mxu0 %v1321_v5  ;;  %v713_v5 = vsub.s32 0, %v712_v4 }
  0x4c   :  { %807 = vmatprep.subr.bf16.mxu0 %v1326_v6  ;;  %v709_v6 = vld [vmem:[%s1703_s4] sm:$0x3] }
  0x4d   :  { %1209 = vmatpush3.bf16.msra.mxu1 %v1344_v22 }
  0x4e   :  { %1210 = vmatprep.subr.bf16.mxu1 %v1345_v23 }
  0x4f   :  { %808 = vmatpush1.bf16.msra.mxu0 %v1324_v7  ;;  %v717_v7 = vsub.s32 1, %v712_v4 }
  0x50   :  { %809 = vmatprep.subr.bf16.mxu0 %v1329_v8  ;;  %v714_v8 = vrot.slane %v709_v6, %v713_v5 }
  0x51   :  { %1211 = vmatpush3.bf16.msra.mxu1 %v1346_v24 }
  0x52   :  { %1212 = vmatprep.subr.bf16.mxu1 %v1347_v25  ;;  %v1112_v25 = vld [vmem:[%s1704_s6] ss:$0 sm:$0xff] }
  0x53   :  { %810 = vmatpush1.bf16.msra.mxu0 %v1327_v9  ;;  %v718_v9 = vrot.slane %v709_v6, %v717_v7 }
  0x54   :  { %811 = vmatprep.subr.bf16.mxu0 %v1332_v10 }
  0x55   :  { %1213 = vmatpush3.bf16.msra.mxu1 %v1348_v26 }
  0x56   :  { %1214 = vmatprep.subr.bf16.mxu1 %v1349_v27 }
  0x57   :  { %812 = vmatpush1.bf16.msra.mxu0 %v1330_v11 }
  0x58   :  { %813 = vmatprep.subr.bf16.mxu0 %v1335_v12 }
  0x59   :  { %1215 = vmatpush3.bf16.msra.mxu1 %v1350_v62 }
  0x5a   :  { %1216 = vmatprep.subr.bf16.mxu1 %v1351_v63 }
  0x5b   :  { %814 = vmatpush1.bf16.msra.mxu0 %v1333_v13 }
  0x5c   :  { %815 = vmatprep.subr.bf16.mxu0 %v1338_v14 }
  0x5d   :  { %1217 = vmatpush3.bf16.msra.mxu1 %v1352_v0 }
  0x5e   :  { %1218 = vmatprep.subr.bf16.mxu1 %v1353_v1 }
  0x5f   :  { %816 = vmatpush1.bf16.msra.mxu0 %v1336_v15 }
  0x61   :  { %1219 = vmatpush3.bf16.msra.mxu1 %v1354_v2 }
  0xf5   :  { %v1145_v28 = vpop.f32.mrb[0].mxu0 }
  0xf6   :  { %v1146_v30 = vpop.f32.mrb[1].mxu0 }
  0xf7   :  { %v1147_v31 = vadd.f32 %v1146_v30, %v1145_v28  ;;  %v1148_v32 = vpop.f32.mrb[2].mxu0  ;;  %v1167_v33 = vpop.f32.mrb[0].mxu1 }
  0xf8   :  { %v1149_v34 = vpop.f32.mrb[3].mxu0  ;;  %v1168_v37 = vpop.f32.mrb[1].mxu1 }
  0xf9   :  { %v561_v35 = vadd.f32 %v1147_v31, %v1032_v29  ;;  %v1150_v36 = vadd.f32 %v1149_v34, %v1148_v32  ;;  %v1169_v38 = vadd.f32 %v1168_v37, %v1167_v33  ;;  %v1170_v39 = vpop.f32.mrb[2].mxu1 }
  0xfa   :  { %v1171_v41 = vpop.f32.mrb[3].mxu1 }
  0xfb   :  { %v564_v40 = vadd.f32 %v1150_v36, %v1032_v29  ;;  %v602_v42 = vadd.f32 %v1169_v38, %v561_v35  ;;  %v1172_v43 = vadd.f32 %v1171_v41, %v1170_v39 }
  0xfd   :  { %v605_v44 = vadd.f32 %v1172_v43, %v564_v40 }
 0x115   :  { %v1189_v45 = vpop.f32.mrb[4].mxu0 }
 0x116   :  { %v1190_v46 = vpop.f32.mrb[5].mxu0 }
 0x117   :  { %v683_v47 = vpop.f32.mrb[4].mxu1  ;;  %v1191_v48 = vadd.f32 %v1190_v46, %v1189_v45  ;;  %v1192_v49 = vpop.f32.mrb[6].mxu0 }
 0x118   :  { %v1244_v50 = vpop.f32.mrb[5].mxu1  ;;  %v1193_v51 = vpop.f32.mrb[7].mxu0 }
 0x119   :  { %v686_v52 = vpop.f32.mrb[6].mxu1  ;;  %v643_v53 = vadd.f32 %v1191_v48, %v602_v42  ;;  %v1194_v54 = vadd.f32 %v1193_v51, %v1192_v49 }
 0x11a   :  { %v1245_v55 = vpop.f32.mrb[7].mxu1 }
 0x11b   :  { %v684_v56 = vadd.f32 %v683_v47, %v643_v53  ;;  %v646_v57 = vadd.f32 %v1194_v54, %v605_v44 }
 0x11d   :  { %v687_v58 = vadd.f32 %v686_v52, %v646_v57  ;;  %v690_v59 = vmax.f32 %v684_v56, 0.0 }
 0x11f   :  { %v691_v60 = vmax.f32 %v687_v58, 0.0 }
 0x121   :  { %v692_v61 = vpack.c.bf16 %v691_v60, %v690_v59 }
 0x123   :  { %834 = vmatmul.mubr.bf16.vlgmr.msra.gmra.mrb[8].mxu0 %v692_v61 }
 0x1f6   :  { %v835_v10 = vpop.f32.mrb[8].mxu0 }
 0x1f7   :  { %v836_v11 = vadd.f32 %v835_v10, %v714_v8  ;;  %v837_v12 = vpop.f32.mrb[9].mxu0 }
 0x1f8   :  { %v838_v13 = vadd.f32 %v837_v12, %v718_v9  ;;  %v839_v14 = vpop.f32.mrb[10].mxu0 }
 0x1f9   :  { %v840_v15 = vadd.f32 %v839_v14, %v714_v8  ;;  %v841_v16 = vpop.f32.mrb[11].mxu0  ;;  %v844_v18 = vmax.f32 %v836_v11, 0.0 }
 0x1fa   :  { %v842_v17 = vadd.f32 %v841_v16, %v718_v9  ;;  %v845_v20 = vmax.f32 %v838_v13, 0.0 }
 0x1fb   :  { %v846_v19 = vmax.f32 %v840_v15, 0.0 }
 0x1fc   :  { %v847_v21 = vmax.f32 %v842_v17, 0.0 }
 0x1fd   :  { %v848_v22 = vpack.c.bf16 %v846_v19, %v844_v18 }
 0x1fe   :  { %v849_v23 = vpack.c.bf16 %v847_v21, %v845_v20 }
 0x200   :  { %1017 = vmatprep.mubr.bf16.mxu1 %v849_v23 }
 0x201   :  { %1018 = vmatmul.mubr.bf16.vlgmr.msra.gmra.mrb[8].mxu1 %v848_v22 }
 0x2d4   :  { %v1220_v24 = vpop.f32.mrb[8].mxu1 }
 0x2d5   :  { %v1221_v26 = vpop.f32.mrb[9].mxu1 }
 0x2d6   :  { %v1222_v27 = vadd.f32 %v1221_v26, %v1220_v24  ;;  %v1223_v28 = vpop.f32.mrb[10].mxu1 }
 0x2d7   :  { %v1224_v29 = vpop.f32.mrb[11].mxu1 }
 0x2d8   :  { %v1020_v30 = vadd.f32 %v1222_v27, %v1112_v25  ;;  %v1225_v31 = vadd.f32 %v1224_v29, %v1223_v28 }
 0x2da   :  { %1026 = vst [vmem:[%s1705_s7] sm:$0xff] %v1020_v30  ;;  %v1023_v32 = vadd.f32 %v1225_v31, %v1112_v25 }
 0x2dc   :  { %1027 = vst [vmem:[%s1705_s7 + $0x8] sm:$0xff] %v1023_v32 }

</bundles_post_ra>
